<compile_context>
chip_gen: v7x
topology: tpu7x:2x2x1
jax: 0.10.0
libtpu: 0.0.40
codegen_flags: <defaults>
</compile_context>

<pallas_src>
import jax
import jax.numpy as jnp
from jax.experimental import pallas as pl
from jax.experimental.pallas import tpu as pltpu


def policy_net_kernel(x_ref, w1_ref, b1_ref, w2_ref, b2_ref, o_ref):
    x = x_ref[...]                              # (TB, S) f32
    TB, S = x_ref.shape
    H = w1_ref.shape[1]

    # ---- fc1 + bias + ReLU -------------------------------------------------
    if S <= 16:
        # Tiny contraction: S unrolled VPU FMAs on resident vregs instead of an
        # MXU push/pop (MXU would be <4% utilized and adds result-FIFO latency).
        # Bias is folded into the first multiply-add.
        h = x[:, 0:1] * w1_ref[0:1, :] + b1_ref[...]        # (TB, H)
        for k in range(1, S):
            h = h + x[:, k:k + 1] * w1_ref[k:k + 1, :]
    else:
        h = jnp.dot(x, w1_ref[...], preferred_element_type=jnp.float32)
        h = h + b1_ref[...]
    h = jnp.maximum(h, 0.0)

    # ---- fc2 (MXU, f32 accumulation) ---------------------------------------
    logits = jnp.dot(h, w2_ref[...], preferred_element_type=jnp.float32)
    logits = logits + b2_ref[...]                            # (TB, A)

    # ---- softmax over the action axis (dim=1 of the 2-D input) -------------
    m = jnp.max(logits, axis=-1, keepdims=True)
    e = jnp.exp(logits - m)
    denom = jnp.sum(e, axis=-1, keepdims=True)
    # approx reciprocal lowers to the EUP slot -> effectively free vs. VALU divide
    o_ref[...] = (e * pl.reciprocal(denom, approx=True)).astype(o_ref.dtype)
    # TODO(synk): output stays (B, action_dim=8) lane-sparse (masked vst); fuse the
    # downstream consumer (action sampling / log-prob) into this kernel to make the
    # writeback lane-dense.


def _round_up(n, m):
    return ((n + m - 1) // m) * m


def policy_net_forward(x, w1, b1, w2, b2, *, block_batch=512):
    """x: (B, state_dim) f32. w1: (state_dim, hidden), w2: (hidden, action_dim),
    b1: (1, hidden), b2: (1, action_dim). Returns (B, action_dim) f32 probs."""
    B, S = x.shape
    H = w1.shape[1]
    A = w2.shape[1]

    # Sublane-aligned batch tile: 512 rows for big batches, whole batch (rounded
    # up to a multiple of 8) for small ones. OOB rows in a partial block are
    # row-independent garbage and their stores are masked off by Pallas.
    TB = min(block_batch, _round_up(B, 8))
    grid = (pl.cdiv(B, TB),)

    return pl.pallas_call(
        policy_net_kernel,
        out_shape=jax.ShapeDtypeStruct((B, A), jnp.float32),
        grid=grid,
        in_specs=[
            pl.BlockSpec((TB, S), lambda i: (i, 0)),   # x: tiled over batch
            pl.BlockSpec((S, H), lambda i: (0, 0)),    # w1: resident
            pl.BlockSpec((1, H), lambda i: (0, 0)),    # b1: resident
            pl.BlockSpec((H, A), lambda i: (0, 0)),    # w2: resident
            pl.BlockSpec((1, A), lambda i: (0, 0)),    # b2: resident
        ],
        out_specs=pl.BlockSpec((TB, A), lambda i: (i, 0)),
        compiler_params=pltpu.CompilerParams(
            dimension_semantics=("parallel",),          # megacore sharding on v7x
        ),
    )(x, w1, b1, w2, b2)


def init_params(key, state_dim, hidden_dim, action_dim):
    """Deterministic synthetic init (PyTorch-Linear-like uniform bounds)."""
    k1, k2, k3, k4 = jax.random.split(key, 4)
    bound1 = 1.0 / (state_dim ** 0.5)
    bound2 = 1.0 / (hidden_dim ** 0.5)
    # Stored pre-transposed as (in, out) for the kernel.
    w1 = jax.random.uniform(k1, (state_dim, hidden_dim), jnp.float32, -bound1, bound1)
    b1 = jax.random.uniform(k2, (1, hidden_dim), jnp.float32, -bound1, bound1)
    w2 = jax.random.uniform(k3, (hidden_dim, action_dim), jnp.float32, -bound2, bound2)
    b2 = jax.random.uniform(k4, (1, action_dim), jnp.float32, -bound2, bound2)
    return w1, b1, w2, b2


if __name__ == "__main__":
    state_dim, hidden_dim, action_dim = 4, 32, 8
    batch = 2

    key = jax.random.PRNGKey(0)
    kx, kp = jax.random.split(key)
    x = jax.random.normal(kx, (batch, state_dim), dtype=jnp.float32)
    w1, b1, w2, b2 = init_params(kp, state_dim, hidden_dim, action_dim)

    probs = policy_net_forward(x, w1, b1, w2, b2)
    probs = jax.block_until_ready(probs)

    # Sanity check against a pure-JAX reference (same math as the PyTorch module).
    # Tolerance loosened to cover pl.reciprocal(approx=True) (~1e-3 relative).
    h_ref = jnp.maximum(x @ w1 + b1, 0.0)
    logits_ref = h_ref @ w2 + b2
    ref = jax.nn.softmax(logits_ref, axis=1)
    assert probs.shape == (batch, action_dim)
    assert jnp.allclose(probs, ref, atol=2e-3, rtol=2e-3)
    assert jnp.allclose(jnp.sum(probs, axis=1), 1.0, atol=2e-3)

    print("KERNEL_OK")
</pallas_src>

<mosaic_0001>
module attributes {stable_mosaic.version = 11 : i64} {
  func.func @policy_net_kernel(%arg0: i32, %arg1: memref<8x4xf32, #tpu.memory_space<vmem>>, %arg2: memref<4x32xf32, #tpu.memory_space<vmem>>, %arg3: memref<1x32xf32, #tpu.memory_space<vmem>>, %arg4: memref<32x8xf32, #tpu.memory_space<vmem>>, %arg5: memref<1x8xf32, #tpu.memory_space<vmem>>, %arg6: memref<8x8xf32, #tpu.memory_space<vmem>>) attributes {dimension_semantics = [#tpu.dimension_semantics<parallel>], iteration_bounds = array<i64: 1>, scalar_prefetch = 0 : i64, scratch_operands = 0 : i64, tpu.core_type = #tpu.core_type<tc>, window_params = [{transform_indices = @transform_0, window_bounds = array<i64: 8, 4>}, {pipeline_mode = #tpu.pipeline_mode<synchronous>, transform_indices = @transform_1, window_bounds = array<i64: 4, 32>}, {pipeline_mode = #tpu.pipeline_mode<synchronous>, transform_indices = @transform_2, window_bounds = array<i64: 1, 32>}, {pipeline_mode = #tpu.pipeline_mode<synchronous>, transform_indices = @transform_3, window_bounds = array<i64: 32, 8>}, {pipeline_mode = #tpu.pipeline_mode<synchronous>, transform_indices = @transform_4, window_bounds = array<i64: 1, 8>}, {transform_indices = @transform_5, window_bounds = array<i64: 8, 8>}]} {
    %c0 = arith.constant 0 : index
    %c0_0 = arith.constant 0 : index
    %0 = vector.load %arg1[%c0, %c0_0] : memref<8x4xf32, #tpu.memory_space<vmem>>, vector<8x4xf32>
    %1 = vector.extract_strided_slice %0 {offsets = [0, 0], sizes = [8, 1], strides = [1, 1]} : vector<8x4xf32> to vector<8x1xf32>
    %c0_1 = arith.constant 0 : index
    %c0_2 = arith.constant 0 : index
    %2 = vector.load %arg2[%c0_1, %c0_2] : memref<4x32xf32, #tpu.memory_space<vmem>>, vector<1x32xf32>
    %3 = vector.broadcast %1 : vector<8x1xf32> to vector<8x32xf32>
    %4 = vector.broadcast %2 : vector<1x32xf32> to vector<8x32xf32>
    %5 = arith.mulf %3, %4 : vector<8x32xf32>
    %c0_3 = arith.constant 0 : index
    %c0_4 = arith.constant 0 : index
    %6 = vector.load %arg3[%c0_3, %c0_4] : memref<1x32xf32, #tpu.memory_space<vmem>>, vector<1x32xf32>
    %7 = vector.broadcast %6 : vector<1x32xf32> to vector<8x32xf32>
    %8 = arith.addf %5, %7 : vector<8x32xf32>
    %9 = vector.extract_strided_slice %0 {offsets = [0, 1], sizes = [8, 1], strides = [1, 1]} : vector<8x4xf32> to vector<8x1xf32>
    %c1 = arith.constant 1 : index
    %c0_5 = arith.constant 0 : index
    %10 = vector.load %arg2[%c1, %c0_5] : memref<4x32xf32, #tpu.memory_space<vmem>>, vector<1x32xf32>
    %11 = vector.broadcast %9 : vector<8x1xf32> to vector<8x32xf32>
    %12 = vector.broadcast %10 : vector<1x32xf32> to vector<8x32xf32>
    %13 = arith.mulf %11, %12 : vector<8x32xf32>
    %14 = arith.addf %8, %13 : vector<8x32xf32>
    %15 = vector.extract_strided_slice %0 {offsets = [0, 2], sizes = [8, 1], strides = [1, 1]} : vector<8x4xf32> to vector<8x1xf32>
    %c2 = arith.constant 2 : index
    %c0_6 = arith.constant 0 : index
    %16 = vector.load %arg2[%c2, %c0_6] : memref<4x32xf32, #tpu.memory_space<vmem>>, vector<1x32xf32>
    %17 = vector.broadcast %15 : vector<8x1xf32> to vector<8x32xf32>
    %18 = vector.broadcast %16 : vector<1x32xf32> to vector<8x32xf32>
    %19 = arith.mulf %17, %18 : vector<8x32xf32>
    %20 = arith.addf %14, %19 : vector<8x32xf32>
    %21 = vector.extract_strided_slice %0 {offsets = [0, 3], sizes = [8, 1], strides = [1, 1]} : vector<8x4xf32> to vector<8x1xf32>
    %c3 = arith.constant 3 : index
    %c0_7 = arith.constant 0 : index
    %22 = vector.load %arg2[%c3, %c0_7] : memref<4x32xf32, #tpu.memory_space<vmem>>, vector<1x32xf32>
    %23 = vector.broadcast %21 : vector<8x1xf32> to vector<8x32xf32>
    %24 = vector.broadcast %22 : vector<1x32xf32> to vector<8x32xf32>
    %25 = arith.mulf %23, %24 : vector<8x32xf32>
    %26 = arith.addf %20, %25 : vector<8x32xf32>
    %cst = arith.constant 0.000000e+00 : f32
    %27 = vector.broadcast %cst : f32 to vector<8x32xf32>
    %28 = arith.maximumf %26, %27 : vector<8x32xf32>
    %c0_8 = arith.constant 0 : index
    %c0_9 = arith.constant 0 : index
    %29 = vector.load %arg4[%c0_8, %c0_9] : memref<32x8xf32, #tpu.memory_space<vmem>>, vector<32x8xf32>
    %cst_10 = arith.constant dense<0.000000e+00> : vector<8x8xf32>
    %30 = tpu.matmul %28, %29, %cst_10 {dimension_numbers = #tpu.dot_dimension_numbers<[1], [0], [0], [1], [0, 0, 1, 1], [], []>} : vector<8x32xf32>, vector<32x8xf32>, vector<8x8xf32> -> vector<8x8xf32>
    %c0_11 = arith.constant 0 : index
    %c0_12 = arith.constant 0 : index
    %31 = vector.load %arg5[%c0_11, %c0_12] : memref<1x8xf32, #tpu.memory_space<vmem>>, vector<1x8xf32>
    %32 = vector.broadcast %31 : vector<1x8xf32> to vector<8x8xf32>
    %33 = arith.addf %30, %32 : vector<8x8xf32>
    %cst_13 = arith.constant dense<0xFF800000> : vector<8xf32>
    %34 = vector.multi_reduction <maximumf>, %33, %cst_13 [1] : vector<8x8xf32> to vector<8xf32>
    %35 = vector.shape_cast %34 : vector<8xf32> to vector<8x1xf32>
    %36 = vector.broadcast %35 : vector<8x1xf32> to vector<8x8xf32>
    %37 = arith.subf %33, %36 : vector<8x8xf32>
    %38 = math.exp %37 : vector<8x8xf32>
    %cst_14 = arith.constant dense<0.000000e+00> : vector<8xf32>
    %39 = vector.multi_reduction <add>, %38, %cst_14 [1] : vector<8x8xf32> to vector<8xf32>
    %40 = vector.shape_cast %39 : vector<8xf32> to vector<8x1xf32>
    %41 = tpu.reciprocal %40 {approx = true} : vector<8x1xf32> -> vector<8x1xf32>
    %42 = vector.broadcast %41 : vector<8x1xf32> to vector<8x8xf32>
    %43 = arith.mulf %38, %42 : vector<8x8xf32>
    %c0_15 = arith.constant 0 : index
    %c0_16 = arith.constant 0 : index
    %44 = vector.load %arg6[%c0_15, %c0_16] : memref<8x8xf32, #tpu.memory_space<vmem>>, vector<8x8xf32>
    tpu.vector_store %arg6[%c0_15, %c0_16], %43 {strides = array<i32>} : memref<8x8xf32, #tpu.memory_space<vmem>>, vector<8x8xf32>,
    return
  }
  func.func @transform_0(%arg0: i32) -> (i32, i32) {
    %c0_i32 = arith.constant 0 : i32
    %c0_i32_0 = arith.constant 0 : i32
    return %arg0, %c0_i32 : i32, i32
  }
  func.func @transform_1(%arg0: i32) -> (i32, i32) {
    %c0_i32 = arith.constant 0 : i32
    %c0_i32_0 = arith.constant 0 : i32
    %c0_i32_1 = arith.constant 0 : i32
    return %c0_i32, %c0_i32_0 : i32, i32
  }
  func.func @transform_2(%arg0: i32) -> (i32, i32) {
    %c0_i32 = arith.constant 0 : i32
    %c0_i32_0 = arith.constant 0 : i32
    %c0_i32_1 = arith.constant 0 : i32
    return %c0_i32, %c0_i32_0 : i32, i32
  }
  func.func @transform_3(%arg0: i32) -> (i32, i32) {
    %c0_i32 = arith.constant 0 : i32
    %c0_i32_0 = arith.constant 0 : i32
    %c0_i32_1 = arith.constant 0 : i32
    return %c0_i32, %c0_i32_0 : i32, i32
  }
  func.func @transform_4(%arg0: i32) -> (i32, i32) {
    %c0_i32 = arith.constant 0 : i32
    %c0_i32_0 = arith.constant 0 : i32
    %c0_i32_1 = arith.constant 0 : i32
    return %c0_i32, %c0_i32_0 : i32, i32
  }
  func.func @transform_5(%arg0: i32) -> (i32, i32) {
    %c0_i32 = arith.constant 0 : i32
    %c0_i32_0 = arith.constant 0 : i32
    return %arg0, %c0_i32 : i32, i32
  }
}

</mosaic_0001>

<bundles_post_ra>
// kernel: tpu_custom_call.1
= control target key start
LH: loop header
LB: loop body
LE: loop exit
PB: predicated region body
PF: predicated region fallthrough
CT: control target
= control target key end

     0   :  { %v261_v1 = vmov 0   ;;  %v262_v2 = vmov 2   ;;  %s349_s0 = inlined_call_operand.vmem [shape: f32[2,4], index: 0, kind: input, shape index: {}]   ;;  %s350_s1 = inlined_call_operand.vmem [shape: f32[4,32], index: 1, kind: input, shape index: {}]   ;;  %s351_s2 = inlined_call_operand.vmem [shape: f32[1,32], index: 2, kind: input, shape index: {}]   ;;  %s352_s3 = inlined_call_operand.vmem [shape: f32[32,8], index: 3, kind: input, shape index: {}]   ;;  %s353_s4 = inlined_call_operand.vmem [shape: f32[1,8], index: 4, kind: input, shape index: {}]   ;;  %s354_s5 = inlined_call_operand.hbm [shape: f32[2,8], index: 5, kind: output, shape index: {}]  }
   0x1   :  { %v21_v0 = vld [vmem:[%s349_s0] sm:$0xff]  ;;  %228 = vset.pattern.permute.xlu0 %v261_v1  ;;  %230 = vset.pattern.permute.xlu1 %v262_v2 }
   0x2   :  { %10 = vsyncpa [#allocation3], 0  ;;  %25 = vperm.xlu0 %228, %v21_v0   ;;  %54 = vperm.xlu1 %230, %v21_v0   ;;  %v263_v3 = vmov 1   ;;  %v264_v4 = vmov 3   ;;  %v75_v5 = vld [vmem:[%s352_s3] sm:$0xff]  ;;  %v76_v6 = vld [vmem:[%s352_s3 + $0x8] sm:$0xff] }
   0x3   :  { %v213_v7 = vpack.c.bf16 %v76_v6, %v75_v5  ;;  %v265_v8 = vmov 0.0|0.0   ;;  %v77_v9 = vld [vmem:[%s352_s3 + $0x10] sm:$0xff]  ;;  %v78_v10 = vld [vmem:[%s352_s3 + $0x18] sm:$0xff]  ;;  %vm266_vm0 = vmmov 0   ;;  %v267_v12 = vmov 0.0  }
   0x4   :  { %212 = vmatprep.subr.bf16.mxu0 %v265_v8  ;;  %v216_v11 = vpack.c.bf16 %v78_v10, %v77_v9  ;;  %209 = vmatprep.mubr.msk.f32.mxu0 %vm266_vm0, %v267_v12  ;;  %v189_v13 = vld [vmem:[%s350_s1] ss:$0 sm:$0xff]  ;;  %v191_v18 = vld [vmem:[%s350_s1 + $0x1] ss:$0 sm:$0xff]  ;;  %v192_v19 = vld [vmem:[%s350_s1 + $0x2] ss:$0 sm:$0xff] }
   0x5   :  { %214 = vmatpush3.bf16.msra.mxu0 %v213_v7  ;;  %v190_v17 = vld [vmem:[%s351_s2] ss:$0 sm:$0xff]  ;;  %v193_v21 = vld [vmem:[%s350_s1 + $0x3] ss:$0 sm:$0xff]  ;;  %vm86_vm1 = vcmask 261120   ;;  %vm160_vm2 = vcmask 64512  }
   0x6   :  { %229 = vset.pattern.permute.xlu0 %v263_v3  ;;  %231 = vset.pattern.permute.xlu1 %v264_v4  ;;  %v194_v31 = vld [vmem:[%s353_s4] ss:$0 sm:$0xff] }
   0x7   :  { %43 = vperm.xlu0 %229, %v21_v0   ;;  %65 = vperm.xlu1 %231, %v21_v0  }
   0x8   :  { %215 = vmatprep.subr.bf16.mxu0 %v265_v8 }
   0x9   :  { %217 = vmatpush3.bf16.msra.mxu0 %v216_v11 }
   0xb   :  { %232 = vset.pattern.permute.xlu0 %v264_v4 }
  0x81   :  { %v26_v14 = vpop.permute.xlu0 %25  ;;  %v55_v15 = vpop.permute.xlu1 %54 }
  0x82   :  { %v32_v16 = vmul.f32 %v189_v13, %v26_v14  ;;  %v61_v25 = vmul.f32 %v192_v19, %v55_v15 }
  0x84   :  { %v40_v23 = vadd.f32 %v190_v17, %v32_v16 }
  0x86   :  { %v44_v20 = vpop.permute.xlu0 %43  ;;  %v66_v22 = vpop.permute.xlu1 %65 }
  0x87   :  { %v50_v24 = vmul.f32 %v191_v18, %v44_v20  ;;  %v72_v27 = vmul.f32 %v193_v21, %v66_v22 }
  0x89   :  { %v51_v26 = vadd.f32 %v50_v24, %v40_v23 }
  0x8b   :  { %v62_v28 = vadd.f32 %v61_v25, %v51_v26 }
  0x8d   :  { %v73_v29 = vadd.f32 %v72_v27, %v62_v28 }
  0x8f   :  { %v74_v30 = vmax.f32 %v73_v29, 0.0 }
  0x91   :  { %210 = vmatmul.mubr.msk.f32.vlgmr.msra.gmra.mrb[0].mxu0 %vm86_vm1, %v74_v30 }
 0x164   :  { %v156_v32 = vpop.f32.mrb[0].mxu0 }
 0x165   :  { %v157_v33 = vadd.f32 %v194_v31, %v156_v32  ;;  %v211_v34 = vpop.f32.mrb[1].mxu0 }
 0x167   :  { %v161_v35 = vsel %vm160_vm2, %v157_v33, -inf }
 0x168   :  { %162 = vmax.xlane.f32.xlu1 %v161_v35 }
 0x1f5   :  { %v163_v36 = vpop.xlane.xlu1 %162 }
 0x1f6   :  { %v164_v37 = vsub.f32 %v157_v33, %v163_v36 }
 0x1f8   :  { %v165_v38 = vmul.f32 1.442695, %v164_v37 }
 0x1fa   :  { %233 = vpow2.f32 %v165_v38 }
 0x204   :  { %v234_v39 = vpop.eup %233 }
 0x205   :  { %v167_v40 = vsel %vm160_vm2, %v234_v39, 0.0 }
 0x206   :  { %168 = vadd.xlane.f32.xlu0 %v167_v40 }
 0x293   :  { %v169_v41 = vpop.xlane.xlu0 %168 }
 0x294   :  { %235 = vrcp.f32 %v169_v41 }
 0x29e   :  { %v236_v42 = vpop.eup %235 }
 0x29f   :  { %v171_v43 = vmul.f32 %v236_v42, %v234_v39 }
 0x2a1   :  { %172 = vst.msk [vmem:[#allocation2] sm:$0xff] %vm160_vm2, %v171_v43 }
 0x2a2   :  { %177 = vsyncadd [#allocation3], 96  ;;  %s268_s1 = smov [#allocation2]  }
 0x2a3   :  { %s178_s4 = sshll.u32 %s268_s1, 4  ;;  %s179_s4 = int_to_ptr.vmem [resolvable:$true] %s178_s4 }
 0x2a4   :  { %s237_s12 = scalar_lea.vmem %s179_s4, 32  ;;  %s241_s13 = scalar_lea.vmem %s179_s4, 128 }
 0x2a5   :  { %p238_p0 = scmp.ne.s32.totalorder %s179_s4, %s237_s12  ;;  %p242_p1 = scmp.lt.s32.totalorder %s179_s4, %s179_s4 }
 0x2a6   :  { %p243_p2 = scmp.lt.s32.totalorder %s241_s13, %s237_s12 }
 0x2a8   :  { %p244_p3 = por %p243_p2, %p242_p1 }
 0x2aa   :  { %p245_p4 = pnand %p244_p3, %p238_p0 }
 0x2ac   :  { %248 = shalt.err (!%p245_p4)
}
 0x2ad   :  { %s249_s16 = scalar_lea.hbm %s354_s5, 32 }
 0x2ae   :  { %p250_p5 = scmp.ne.s32.totalorder %s354_s5, %s249_s16  ;;  %p253_p6 = scmp.lt.u32.totalorder %s249_s16, %s354_s5 }
 0x2b0   :  { %p255_p7 = pnand %p253_p6, %p250_p5 }
 0x2b2   :  { %258 = shalt.err (!%p255_p7)
}
 0x2b3   :  { %s269_s21 = smov 32   ;;  %s270_s22 = smov 2  }
 0x2b4   :  { %184 = dma.vmem_to_hbm [thread:$0]  %s179_s4, 32, %s354_s5, [#allocation3], %s269_s21, %s269_s21, %s270_s22  }
 0x2b5   :  { %259 = dma.done.wait [#allocation3], 128  }
 0x2b6   :  { %260 = vsyncadd [#allocation3], 4294967168 }
 0x2b7   :  { %188 = vsyncpa [#allocation3], 1 }

</bundles_post_ra>
